<compile_context>
chip_gen: v7x
topology: tpu7x:2x2x1
jax: 0.10.0
libtpu: 0.0.40
codegen_flags: <defaults>
</compile_context>

<pallas_src>
import functools

import jax
import jax.numpy as jnp
from jax.experimental import pallas as pl
from jax.experimental.pallas import tpu as pltpu


def _make_kernel(B, T, E, H, V, A, max_len, sos_id):
    f32 = jnp.float32
    bf16 = jnp.bfloat16

    def kernel(emb_ref,      # (V, H)          bf16  embedding table
               w_in_ref,     # (H+E, 3H)       bf16  fused GRU input weights (gates r|z|n)
               w_hh_ref,     # (H, 3H)         bf16  fused GRU hidden weights (gates r|z|n)
               bi_ref,       # (1, 3H)         f32   GRU bias_ih
               bh_ref,       # (1, 3H)         f32   GRU bias_hh
               ck_ref,       # (3, A)          f32   location-conv taps (t-1, t, t+1)
               attw_ref,     # (H, A)          bf16  attention W (decoder-state proj)
               afw_ref,      # (1, A)          f32   attention fc weight
               afb_ref,      # (1, 1)          f32   attention fc bias
               fcw_ref,      # (H+E, V)        bf16  fused output projection [h | ctx]
               fcb_ref,      # (1, V)          f32   output bias
               vv_ref,       # (B, T, A)       f32   V(enc) + att_b + conv_b  (loop-invariant)
               enc_ref,      # (B, T, E)       f32   encoder outputs
               o_ref):       # (max_len, B, V) f32   resident decoder log-probs

        # ---- loop-invariant compute, done exactly once ----
        iota_v = jax.lax.broadcasted_iota(jnp.int32, (B, V), 1)
        zcol = jnp.zeros((B, 1), f32)

        def step(t, carry):
            h, ctx, aw, tok = carry           # (B,H) (B,E) (B,T) (B,V), all f32

            # -- embedding lookup (one-hot matmul; dropout_p=0 -> identity) --
            x = jnp.dot(tok.astype(bf16), emb_ref[...],
                        preferred_element_type=f32)                        # (B, H)

            # -- fused single-layer GRU cell (PyTorch gate order r, z, n) --
            xc = jnp.concatenate([x, ctx], axis=1).astype(bf16)            # (B, H+E)
            gi = jnp.dot(xc, w_in_ref[...], preferred_element_type=f32) + bi_ref[...]
            gh = (jnp.dot(h.astype(bf16), w_hh_ref[...], preferred_element_type=f32)
                  + bh_ref[...])                                           # (B, 3H)
            r = jax.nn.sigmoid(gi[:, 0:H] + gh[:, 0:H])
            z = jax.nn.sigmoid(gi[:, H:2 * H] + gh[:, H:2 * H])
            n = jnp.tanh(gi[:, 2 * H:3 * H] + r * gh[:, 2 * H:3 * H])
            h_new = (1.0 - z) * n + z * h                                  # (B, H)

            # -- location-aware attention --
            # Conv1d(1, A, k=3, pad=1) over the previous attention weights; the
            # shifted copies are pure lane shifts (slice + concat with a zero
            # column), so the boundary zero-padding is exact.  The conv bias and
            # attention bias `b` are pre-folded into vv_ref.
            x_prev = jnp.concatenate([zcol, aw[:, :T - 1]], axis=1)        # aw[:, t-1]
            x_next = jnp.concatenate([aw[:, 1:], zcol], axis=1)            # aw[:, t+1]
            ck = ck_ref[...]
            conv_attn = (x_prev[:, :, None] * ck[0:1, :]
                         + aw[:, :, None] * ck[1:2, :]
                         + x_next[:, :, None] * ck[2:3, :])                # (B, T, A)

            wq = jnp.dot(h_new.astype(bf16), attw_ref[...],
                         preferred_element_type=f32)                       # (B, A)
            e_t = jnp.tanh(wq[:, None, :] + vv_ref[...] + conv_attn)       # (B, T, A)
            score = jnp.sum(e_t * afw_ref[...], axis=-1) + afb_ref[...]    # (B, T)

            m = jnp.max(score, axis=-1, keepdims=True)
            ex = jnp.exp(score - m)
            aw_new = ex / jnp.sum(ex, axis=-1, keepdims=True)              # softmax(enc_T)
            ctx_new = jnp.sum(aw_new[:, :, None] * enc_ref[...], axis=1)   # (B, E) = bmm

            # -- fused output projection + log_softmax (f32) --
            hc = jnp.concatenate([h_new, ctx_new], axis=1).astype(bf16)    # (B, H+E)
            logits = (jnp.dot(hc, fcw_ref[...], preferred_element_type=f32)
                      + fcb_ref[...])                                      # (B, V)
            mx = jnp.max(logits, axis=-1, keepdims=True)
            lse = mx + jnp.log(jnp.sum(jnp.exp(logits - mx), axis=-1, keepdims=True))
            o_ref[t] = logits - lse

            # -- greedy argmax (topk(1), ties -> lowest index) -> next one-hot token --
            idx = jnp.min(jnp.where(logits == mx, iota_v, V), axis=-1, keepdims=True)
            tok_new = (iota_v == idx).astype(f32)

            return h_new, ctx_new, aw_new, tok_new

        h0 = jnp.zeros((B, H), f32)                 # decoder_hidden = None -> zeros
        ctx0 = jnp.zeros((B, E), f32)
        aw0 = jnp.zeros((B, T), f32)
        tok0 = (iota_v == sos_id).astype(f32)       # one-hot(sos_id)
        jax.lax.fori_loop(0, max_len, step, (h0, ctx0, aw0, tok0))

    return kernel


@functools.partial(jax.jit, static_argnames=("max_len", "sos_id"))
def decoder_rnn_forward(params, encoder_outputs, *, max_len, sos_id):
    """Greedy decode (teacher_forcing_ratio=0). Returns (max_len, B, vocab) log-probs."""
    B, T, E = encoder_outputs.shape
    emb = params["embedding"]                 # (V, H)
    V, H = emb.shape
    A = params["att_W"].shape[0]              # attn_dim == hidden_size in DecoderRNN

    bf16, f32 = jnp.bfloat16, jnp.float32

    # ---- fuse / transpose / cast weights into the kernel layout (x @ W convention) ----
    w_in = jnp.transpose(params["gru_w_ih"]).astype(bf16)   # (H+E, 3H): rows [emb|ctx]
    w_hh = jnp.transpose(params["gru_w_hh"]).astype(bf16)   # (H, 3H)
    bi = params["gru_b_ih"].reshape(1, 3 * H).astype(f32)
    bh = params["gru_b_hh"].reshape(1, 3 * H).astype(f32)
    ck = jnp.transpose(params["att_conv_w"][:, 0, :]).astype(f32)   # (3, A): taps t-1,t,t+1
    attw = jnp.transpose(params["att_W"]).astype(bf16)       # (H, A)
    afw = params["att_fc_w"].reshape(1, A).astype(f32)
    afb = params["att_fc_b"].reshape(1, 1).astype(f32)
    fcw = jnp.transpose(params["fc_w"]).astype(bf16)         # (H+E, V): rows [h | ctx]
    fcb = params["fc_b"].reshape(1, V).astype(f32)

    enc = encoder_outputs.astype(f32)
    # Loop-invariant attention term: V(enc) + attention bias b + conv bias, hoisted
    # out of the decode loop entirely.
    vv = (jnp.einsum("bte,ae->bta", enc, params["att_V"])
          + params["att_b"].reshape(1, 1, A)
          + params["att_conv_b"].reshape(1, 1, A)).astype(f32)      # (B, T, A)

    arrays = [emb.astype(bf16), w_in, w_hh, bi, bh, ck,
              attw, afw, afb, fcw, fcb, vv, enc]

    kernel = _make_kernel(B, T, E, H, V, A, max_len, sos_id)
    # No grid: every operand is a whole-array, single-buffered VMEM block and the
    # output stays VMEM-resident across the whole decode (one writeback DMA).
    vmem = pl.BlockSpec(memory_space=pltpu.MemorySpace.VMEM)
    return pl.pallas_call(
        kernel,
        out_shape=jax.ShapeDtypeStruct((max_len, B, V), f32),
        in_specs=[vmem] * len(arrays),
        out_specs=vmem,
        compiler_params=pltpu.CompilerParams(vmem_limit_bytes=32 * 1024 * 1024),
    )(*arrays)
    # TODO(synk): for large production batches on v7x, shard the batch over the two
    # TensorCores (leading "parallel" grid axis); pointless at B=2.


def init_decoder_params(key, *, vocab_size, hidden_size, encoder_size):
    """Deterministic synthetic parameters with native PyTorch DecoderRNN shapes
    (nn.Embedding, nn.GRU, location-aware Attention, output nn.Linear)."""
    V, H, E = vocab_size, hidden_size, encoder_size
    A = H  # attn_dim = hidden_size
    ks = jax.random.split(key, 16)

    def rnorm(k, shape, scale=0.1):
        return scale * jax.random.normal(k, shape, dtype=jnp.float32)

    return dict(
        embedding=rnorm(ks[0], (V, H)),              # nn.Embedding(V, H).weight
        gru_w_ih=rnorm(ks[1], (3 * H, H + E)),       # GRU weight_ih_l0 (rows r|z|n)
        gru_w_hh=rnorm(ks[2], (3 * H, H)),           # GRU weight_hh_l0
        gru_b_ih=rnorm(ks[3], (3 * H,)),             # GRU bias_ih_l0
        gru_b_hh=rnorm(ks[4], (3 * H,)),             # GRU bias_hh_l0
        att_conv_w=rnorm(ks[5], (A, 1, 3)),          # Conv1d(1, A, 3, pad=1).weight
        att_conv_b=rnorm(ks[6], (A,)),               # Conv1d bias
        att_W=rnorm(ks[7], (A, H)),                  # Attention.W (Linear, no bias)
        att_V=rnorm(ks[8], (A, E)),                  # Attention.V (Linear, no bias)
        att_b=jax.random.uniform(ks[9], (A,), dtype=jnp.float32),   # Attention.b
        att_fc_w=rnorm(ks[10], (1, A)),              # Attention.fc weight
        att_fc_b=rnorm(ks[11], (1,)),                # Attention.fc bias
        fc_w=rnorm(ks[12], (V, H + E)),              # DecoderRNN.fc weight
        fc_b=rnorm(ks[13], (V,)),                    # DecoderRNN.fc bias
    )


if __name__ == "__main__":
    # Small config consistent with the module's forward (teacher_forcing_ratio=0 path).
    VOCAB = 16
    HIDDEN = 32
    ENC_DIM = 32      # encoder_size, bidirectional_encoder=False
    ENC_T = 16
    BATCH = 2
    MAX_LEN = 8
    SOS_ID = 1
    EOS_ID = 2        # only affects torch-side length bookkeeping; outputs unaffected
    # TODO(synk): python-level `random.random()` teacher forcing and the numpy
    # `lengths` / EOS bookkeeping have no in-kernel equivalent; for ratio=0 the
    # returned decoder_outputs (implemented here) do not depend on them.

    key = jax.random.PRNGKey(0)
    k_param, k_enc = jax.random.split(key)
    params = init_decoder_params(k_param, vocab_size=VOCAB, hidden_size=HIDDEN,
                                 encoder_size=ENC_DIM)
    encoder_outputs = jax.random.normal(k_enc, (BATCH, ENC_T, ENC_DIM),
                                        dtype=jnp.float32)

    out = decoder_rnn_forward(params, encoder_outputs,
                              max_len=MAX_LEN, sos_id=SOS_ID)
    out = jax.block_until_ready(out)

    assert out.shape == (MAX_LEN, BATCH, VOCAB)
    assert bool(jnp.all(jnp.isfinite(out)))
    # log_softmax rows must exponentiate-sum to 1
    row_sums = jnp.sum(jnp.exp(out), axis=-1)
    assert bool(jnp.all(jnp.abs(row_sums - 1.0) < 1e-3))
    print("KERNEL_OK")
</pallas_src>

<mosaic_0001>
module attributes {stable_mosaic.version = 11 : i64} {
  func.func @kernel(%arg0: memref<16x32xbf16, #tpu.memory_space<vmem>>, %arg1: memref<64x96xbf16, #tpu.memory_space<vmem>>, %arg2: memref<32x96xbf16, #tpu.memory_space<vmem>>, %arg3: memref<1x96xf32, #tpu.memory_space<vmem>>, %arg4: memref<1x96xf32, #tpu.memory_space<vmem>>, %arg5: memref<3x32xf32, #tpu.memory_space<vmem>>, %arg6: memref<32x32xbf16, #tpu.memory_space<vmem>>, %arg7: memref<1x32xf32, #tpu.memory_space<vmem>>, %arg8: memref<1x1xf32, #tpu.memory_space<vmem>>, %arg9: memref<64x16xbf16, #tpu.memory_space<vmem>>, %arg10: memref<1x16xf32, #tpu.memory_space<vmem>>, %arg11: memref<2x16x32xf32, #tpu.memory_space<vmem>>, %arg12: memref<2x16x32xf32, #tpu.memory_space<vmem>>, %arg13: memref<8x2x16xf32, #tpu.memory_space<vmem>>) attributes {dimension_semantics = [], scalar_prefetch = 0 : i64, scratch_operands = 0 : i64, tpu.core_type = #tpu.core_type<tc>} {
    %0 = tpu.iota {dimensions = array<i32: 1>} : vector<2x16xi32>
    %cst = arith.constant 0.000000e+00 : f32
    %1 = vector.broadcast %cst : f32 to vector<2x1xf32>
    %cst_0 = arith.constant 0.000000e+00 : f32
    %2 = vector.broadcast %cst_0 : f32 to vector<2x32xf32>
    %cst_1 = arith.constant 0.000000e+00 : f32
    %3 = vector.broadcast %cst_1 : f32 to vector<2x32xf32>
    %cst_2 = arith.constant 0.000000e+00 : f32
    %4 = vector.broadcast %cst_2 : f32 to vector<2x16xf32>
    %c1_i32 = arith.constant 1 : i32
    %5 = vector.broadcast %c1_i32 : i32 to vector<2x16xi32>
    %6 = arith.cmpi eq, %0, %5 : vector<2x16xi32>
    %7 = arith.extui %6 : vector<2x16xi1> to vector<2x16xi32>
    %8 = arith.sitofp %7 : vector<2x16xi32> to vector<2x16xf32>
    %c0_i32 = arith.constant 0 : i32
    %c8_i32 = arith.constant 8 : i32
    %9 = arith.addi %c0_i32, %c8_i32 : i32
    %c1_i32_3 = arith.constant 1 : i32
    %10:4 = scf.for %arg14 = %c0_i32 to %9 step %c1_i32_3 iter_args(%arg15 = %2, %arg16 = %3, %arg17 = %4, %arg18 = %8) -> (vector<2x32xf32>, vector<2x32xf32>, vector<2x16xf32>, vector<2x16xf32>)  : i32 {
      %11 = arith.truncf %arg18 : vector<2x16xf32> to vector<2x16xbf16>
      %c0 = arith.constant 0 : index
      %c0_5 = arith.constant 0 : index
      %12 = vector.load %arg0[%c0, %c0_5] : memref<16x32xbf16, #tpu.memory_space<vmem>>, vector<16x32xbf16>
      %cst_6 = arith.constant dense<0.000000e+00> : vector<2x32xf32>
      %13 = tpu.matmul %11, %12, %cst_6 {dimension_numbers = #tpu.dot_dimension_numbers<[1], [0], [0], [1], [0, 0, 1, 1], [], []>} : vector<2x16xbf16>, vector<16x32xbf16>, vector<2x32xf32> -> vector<2x32xf32>
      %14 = tpu.concatenate %13, %arg16 in 1 : vector<2x32xf32>, vector<2x32xf32> -> vector<2x64xf32>
      %15 = arith.truncf %14 : vector<2x64xf32> to vector<2x64xbf16>
      %c0_7 = arith.constant 0 : index
      %c0_8 = arith.constant 0 : index
      %16 = vector.load %arg1[%c0_7, %c0_8] : memref<64x96xbf16, #tpu.memory_space<vmem>>, vector<64x96xbf16>
      %cst_9 = arith.constant dense<0.000000e+00> : vector<2x96xf32>
      %17 = tpu.matmul %15, %16, %cst_9 {dimension_numbers = #tpu.dot_dimension_numbers<[1], [0], [0], [1], [0, 0, 1, 1], [], []>} : vector<2x64xbf16>, vector<64x96xbf16>, vector<2x96xf32> -> vector<2x96xf32>
      %c0_10 = arith.constant 0 : index
      %c0_11 = arith.constant 0 : index
      %18 = vector.load %arg3[%c0_10, %c0_11] : memref<1x96xf32, #tpu.memory_space<vmem>>, vector<1x96xf32>
      %19 = vector.broadcast %18 : vector<1x96xf32> to vector<2x96xf32>
      %20 = arith.addf %17, %19 : vector<2x96xf32>
      %21 = arith.truncf %arg15 : vector<2x32xf32> to vector<2x32xbf16>
      %c0_12 = arith.constant 0 : index
      %c0_13 = arith.constant 0 : index
      %22 = vector.load %arg2[%c0_12, %c0_13] : memref<32x96xbf16, #tpu.memory_space<vmem>>, vector<32x96xbf16>
      %cst_14 = arith.constant dense<0.000000e+00> : vector<2x96xf32>
      %23 = tpu.matmul %21, %22, %cst_14 {dimension_numbers = #tpu.dot_dimension_numbers<[1], [0], [0], [1], [0, 0, 1, 1], [], []>} : vector<2x32xbf16>, vector<32x96xbf16>, vector<2x96xf32> -> vector<2x96xf32>
      %c0_15 = arith.constant 0 : index
      %c0_16 = arith.constant 0 : index
      %24 = vector.load %arg4[%c0_15, %c0_16] : memref<1x96xf32, #tpu.memory_space<vmem>>, vector<1x96xf32>
      %25 = vector.broadcast %24 : vector<1x96xf32> to vector<2x96xf32>
      %26 = arith.addf %23, %25 : vector<2x96xf32>
      %27 = vector.extract_strided_slice %20 {offsets = [0, 0], sizes = [2, 32], strides = [1, 1]} : vector<2x96xf32> to vector<2x32xf32>
      %28 = vector.extract_strided_slice %26 {offsets = [0, 0], sizes = [2, 32], strides = [1, 1]} : vector<2x96xf32> to vector<2x32xf32>
      %29 = arith.addf %27, %28 : vector<2x32xf32>
      %30 = arith.negf %29 : vector<2x32xf32>
      %31 = math.exp %30 : vector<2x32xf32>
      %cst_17 = arith.constant 1.000000e+00 : f32
      %32 = vector.broadcast %cst_17 : f32 to vector<2x32xf32>
      %33 = arith.addf %32, %31 : vector<2x32xf32>
      %34 = arith.divf %32, %33 : vector<2x32xf32>
      %35 = vector.extract_strided_slice %20 {offsets = [0, 32], sizes = [2, 32], strides = [1, 1]} : vector<2x96xf32> to vector<2x32xf32>
      %36 = vector.extract_strided_slice %26 {offsets = [0, 32], sizes = [2, 32], strides = [1, 1]} : vector<2x96xf32> to vector<2x32xf32>
      %37 = arith.addf %35, %36 : vector<2x32xf32>
      %38 = arith.negf %37 : vector<2x32xf32>
      %39 = math.exp %38 : vector<2x32xf32>
      %cst_18 = arith.constant 1.000000e+00 : f32
      %40 = vector.broadcast %cst_18 : f32 to vector<2x32xf32>
      %41 = arith.addf %40, %39 : vector<2x32xf32>
      %42 = arith.divf %40, %41 : vector<2x32xf32>
      %43 = vector.extract_strided_slice %20 {offsets = [0, 64], sizes = [2, 32], strides = [1, 1]} : vector<2x96xf32> to vector<2x32xf32>
      %44 = vector.extract_strided_slice %26 {offsets = [0, 64], sizes = [2, 32], strides = [1, 1]} : vector<2x96xf32> to vector<2x32xf32>
      %45 = arith.mulf %34, %44 : vector<2x32xf32>
      %46 = arith.addf %43, %45 : vector<2x32xf32>
      %47 = math.tanh %46 : vector<2x32xf32>
      %cst_19 = arith.constant 1.000000e+00 : f32
      %48 = vector.broadcast %cst_19 : f32 to vector<2x32xf32>
      %49 = arith.subf %48, %42 : vector<2x32xf32>
      %50 = arith.mulf %49, %47 : vector<2x32xf32>
      %51 = arith.mulf %42, %arg15 : vector<2x32xf32>
      %52 = arith.addf %50, %51 : vector<2x32xf32>
      %53 = vector.extract_strided_slice %arg17 {offsets = [0, 0], sizes = [2, 15], strides = [1, 1]} : vector<2x16xf32> to vector<2x15xf32>
      %54 = tpu.concatenate %1, %53 in 1 : vector<2x1xf32>, vector<2x15xf32> -> vector<2x16xf32>
      %55 = vector.extract_strided_slice %arg17 {offsets = [0, 1], sizes = [2, 15], strides = [1, 1]} : vector<2x16xf32> to vector<2x15xf32>
      %56 = tpu.concatenate %55, %1 in 1 : vector<2x15xf32>, vector<2x1xf32> -> vector<2x16xf32>
      %c0_20 = arith.constant 0 : index
      %c0_21 = arith.constant 0 : index
      %57 = vector.load %arg5[%c0_20, %c0_21] : memref<3x32xf32, #tpu.memory_space<vmem>>, vector<3x32xf32>
      %58 = vector.shape_cast %54 : vector<2x16xf32> to vector<2x16x1xf32>
      %59 = vector.extract_strided_slice %57 {offsets = [0, 0], sizes = [1, 32], strides = [1, 1]} : vector<3x32xf32> to vector<1x32xf32>
      %60 = vector.shape_cast %59 : vector<1x32xf32> to vector<1x1x32xf32>
      %61 = vector.broadcast %58 : vector<2x16x1xf32> to vector<2x16x32xf32>
      %62 = vector.broadcast %60 : vector<1x1x32xf32> to vector<2x16x32xf32>
      %63 = arith.mulf %61, %62 : vector<2x16x32xf32>
      %64 = vector.shape_cast %arg17 : vector<2x16xf32> to vector<2x16x1xf32>
      %65 = vector.extract_strided_slice %57 {offsets = [1, 0], sizes = [1, 32], strides = [1, 1]} : vector<3x32xf32> to vector<1x32xf32>
      %66 = vector.shape_cast %65 : vector<1x32xf32> to vector<1x1x32xf32>
      %67 = vector.broadcast %64 : vector<2x16x1xf32> to vector<2x16x32xf32>
      %68 = vector.broadcast %66 : vector<1x1x32xf32> to vector<2x16x32xf32>
      %69 = arith.mulf %67, %68 : vector<2x16x32xf32>
      %70 = arith.addf %63, %69 : vector<2x16x32xf32>
      %71 = vector.shape_cast %56 : vector<2x16xf32> to vector<2x16x1xf32>
      %72 = vector.extract_strided_slice %57 {offsets = [2, 0], sizes = [1, 32], strides = [1, 1]} : vector<3x32xf32> to vector<1x32xf32>
      %73 = vector.shape_cast %72 : vector<1x32xf32> to vector<1x1x32xf32>
      %74 = vector.broadcast %71 : vector<2x16x1xf32> to vector<2x16x32xf32>
      %75 = vector.broadcast %73 : vector<1x1x32xf32> to vector<2x16x32xf32>
      %76 = arith.mulf %74, %75 : vector<2x16x32xf32>
      %77 = arith.addf %70, %76 : vector<2x16x32xf32>
      %78 = arith.truncf %52 : vector<2x32xf32> to vector<2x32xbf16>
      %c0_22 = arith.constant 0 : index
      %c0_23 = arith.constant 0 : index
      %79 = vector.load %arg6[%c0_22, %c0_23] : memref<32x32xbf16, #tpu.memory_space<vmem>>, vector<32x32xbf16>
      %cst_24 = arith.constant dense<0.000000e+00> : vector<2x32xf32>
      %80 = tpu.matmul %78, %79, %cst_24 {dimension_numbers = #tpu.dot_dimension_numbers<[1], [0], [0], [1], [0, 0, 1, 1], [], []>} : vector<2x32xbf16>, vector<32x32xbf16>, vector<2x32xf32> -> vector<2x32xf32>
      %81 = vector.shape_cast %80 : vector<2x32xf32> to vector<2x1x32xf32>
      %c0_25 = arith.constant 0 : index
      %c0_26 = arith.constant 0 : index
      %c0_27 = arith.constant 0 : index
      %82 = vector.load %arg11[%c0_25, %c0_26, %c0_27] : memref<2x16x32xf32, #tpu.memory_space<vmem>>, vector<2x16x32xf32>
      %83 = vector.broadcast %81 : vector<2x1x32xf32> to vector<2x16x32xf32>
      %84 = arith.addf %83, %82 : vector<2x16x32xf32>
      %85 = arith.addf %84, %77 : vector<2x16x32xf32>
      %86 = math.tanh %85 : vector<2x16x32xf32>
      %c0_28 = arith.constant 0 : index
      %c0_29 = arith.constant 0 : index
      %87 = vector.load %arg7[%c0_28, %c0_29] : memref<1x32xf32, #tpu.memory_space<vmem>>, vector<1x32xf32>
      %88 = vector.shape_cast %87 : vector<1x32xf32> to vector<1x1x32xf32>
      %89 = vector.broadcast %88 : vector<1x1x32xf32> to vector<2x16x32xf32>
      %90 = arith.mulf %86, %89 : vector<2x16x32xf32>
      %cst_30 = arith.constant dense<0.000000e+00> : vector<2x16xf32>
      %91 = vector.multi_reduction <add>, %90, %cst_30 [2] : vector<2x16x32xf32> to vector<2x16xf32>
      %c0_31 = arith.constant 0 : index
      %c0_32 = arith.constant 0 : index
      %92 = vector.load %arg8[%c0_31, %c0_32] : memref<1x1xf32, #tpu.memory_space<vmem>>, vector<1x1xf32>
      %93 = vector.broadcast %92 : vector<1x1xf32> to vector<2x16xf32>
      %94 = arith.addf %91, %93 : vector<2x16xf32>
      %cst_33 = arith.constant dense<0xFF800000> : vector<2xf32>
      %95 = vector.multi_reduction <maximumf>, %94, %cst_33 [1] : vector<2x16xf32> to vector<2xf32>
      %96 = vector.shape_cast %95 : vector<2xf32> to vector<2x1xf32>
      %97 = vector.broadcast %96 : vector<2x1xf32> to vector<2x16xf32>
      %98 = arith.subf %94, %97 : vector<2x16xf32>
      %99 = math.exp %98 : vector<2x16xf32>
      %cst_34 = arith.constant dense<0.000000e+00> : vector<2xf32>
      %100 = vector.multi_reduction <add>, %99, %cst_34 [1] : vector<2x16xf32> to vector<2xf32>
      %101 = vector.shape_cast %100 : vector<2xf32> to vector<2x1xf32>
      %102 = vector.broadcast %101 : vector<2x1xf32> to vector<2x16xf32>
      %103 = arith.divf %99, %102 : vector<2x16xf32>
      %104 = vector.shape_cast %103 : vector<2x16xf32> to vector<2x16x1xf32>
      %c0_35 = arith.constant 0 : index
      %c0_36 = arith.constant 0 : index
      %c0_37 = arith.constant 0 : index
      %105 = vector.load %arg12[%c0_35, %c0_36, %c0_37] : memref<2x16x32xf32, #tpu.memory_space<vmem>>, vector<2x16x32xf32>
      %106 = vector.broadcast %104 : vector<2x16x1xf32> to vector<2x16x32xf32>
      %107 = arith.mulf %106, %105 : vector<2x16x32xf32>
      %cst_38 = arith.constant dense<0.000000e+00> : vector<2x32xf32>
      %108 = vector.multi_reduction <add>, %107, %cst_38 [1] : vector<2x16x32xf32> to vector<2x32xf32>
      %109 = tpu.concatenate %52, %108 in 1 : vector<2x32xf32>, vector<2x32xf32> -> vector<2x64xf32>
      %110 = arith.truncf %109 : vector<2x64xf32> to vector<2x64xbf16>
      %c0_39 = arith.constant 0 : index
      %c0_40 = arith.constant 0 : index
      %111 = vector.load %arg9[%c0_39, %c0_40] : memref<64x16xbf16, #tpu.memory_space<vmem>>, vector<64x16xbf16>
      %cst_41 = arith.constant dense<0.000000e+00> : vector<2x16xf32>
      %112 = tpu.matmul %110, %111, %cst_41 {dimension_numbers = #tpu.dot_dimension_numbers<[1], [0], [0], [1], [0, 0, 1, 1], [], []>} : vector<2x64xbf16>, vector<64x16xbf16>, vector<2x16xf32> -> vector<2x16xf32>
      %c0_42 = arith.constant 0 : index
      %c0_43 = arith.constant 0 : index
      %113 = vector.load %arg10[%c0_42, %c0_43] : memref<1x16xf32, #tpu.memory_space<vmem>>, vector<1x16xf32>
      %114 = vector.broadcast %113 : vector<1x16xf32> to vector<2x16xf32>
      %115 = arith.addf %112, %114 : vector<2x16xf32>
      %cst_44 = arith.constant dense<0xFF800000> : vector<2xf32>
      %116 = vector.multi_reduction <maximumf>, %115, %cst_44 [1] : vector<2x16xf32> to vector<2xf32>
      %117 = vector.shape_cast %116 : vector<2xf32> to vector<2x1xf32>
      %118 = vector.broadcast %117 : vector<2x1xf32> to vector<2x16xf32>
      %119 = arith.subf %115, %118 : vector<2x16xf32>
      %120 = math.exp %119 : vector<2x16xf32>
      %cst_45 = arith.constant dense<0.000000e+00> : vector<2xf32>
      %121 = vector.multi_reduction <add>, %120, %cst_45 [1] : vector<2x16xf32> to vector<2xf32>
      %122 = vector.shape_cast %121 : vector<2xf32> to vector<2x1xf32>
      %123 = math.log %122 : vector<2x1xf32>
      %124 = arith.addf %117, %123 : vector<2x1xf32>
      %125 = vector.broadcast %124 : vector<2x1xf32> to vector<2x16xf32>
      %126 = arith.subf %115, %125 : vector<2x16xf32>
      %127 = arith.index_cast %arg14 : i32 to index
      %c0_46 = arith.constant 0 : index
      %c0_47 = arith.constant 0 : index
      %128 = vector.load %arg13[%127, %c0_46, %c0_47] : memref<8x2x16xf32, #tpu.memory_space<vmem>>, vector<1x2x16xf32>
      %129 = vector.shape_cast %128 : vector<1x2x16xf32> to vector<2x16xf32>
      %130 = vector.shape_cast %126 : vector<2x16xf32> to vector<1x2x16xf32>
      tpu.vector_store %arg13[%127, %c0_46, %c0_47], %130 {strides = array<i32>} : memref<8x2x16xf32, #tpu.memory_space<vmem>>, vector<1x2x16xf32>,
      %131 = vector.broadcast %117 : vector<2x1xf32> to vector<2x16xf32>
      %132 = arith.cmpf oeq, %115, %131 : vector<2x16xf32>
      %c16_i32 = arith.constant 16 : i32
      %133 = vector.broadcast %c16_i32 : i32 to vector<2x16xi32>
      %134 = arith.select %132, %0, %133 : vector<2x16xi1>, vector<2x16xi32>
      %cst_48 = arith.constant dense<2147483647> : vector<2xi32>
      %135 = vector.multi_reduction <minsi>, %134, %cst_48 [1] : vector<2x16xi32> to vector<2xi32>
      %136 = vector.shape_cast %135 : vector<2xi32> to vector<2x1xi32>
      %137 = vector.broadcast %136 : vector<2x1xi32> to vector<2x16xi32>
      %138 = arith.cmpi eq, %0, %137 : vector<2x16xi32>
      %139 = arith.extui %138 : vector<2x16xi1> to vector<2x16xi32>
      %140 = arith.sitofp %139 : vector<2x16xi32> to vector<2x16xf32>
      scf.yield %52, %108, %103, %140 : vector<2x32xf32>, vector<2x32xf32>, vector<2x16xf32>, vector<2x16xf32>
    }
    %c8_i32_4 = arith.constant 8 : i32
    return
  }
}

</mosaic_0001>

<bundles_post_ra>
// kernel: decoder_rnn_forward.1
= control target key start
LH: loop header
LB: loop body
LE: loop exit
PB: predicated region body
PF: predicated region fallthrough
CT: control target
= control target key end

     0   :  { %s1624_s0 = inlined_call_operand.vmem [shape: bf16[16,32], index: 0, kind: input, shape index: {}]   ;;  %s1625_s1 = inlined_call_operand.vmem [shape: bf16[64,96], index: 1, kind: input, shape index: {}]   ;;  %s1626_s2 = inlined_call_operand.vmem [shape: bf16[32,96], index: 2, kind: input, shape index: {}]   ;;  %s1627_s3 = inlined_call_operand.vmem [shape: f32[1,96], index: 3, kind: input, shape index: {}]   ;;  %s1628_s4 = inlined_call_operand.vmem [shape: f32[1,96], index: 4, kind: input, shape index: {}]   ;;  %s1629_s5 = inlined_call_operand.vmem [shape: f32[3,32], index: 5, kind: input, shape index: {}]   ;;  %s1630_s6 = inlined_call_operand.vmem [shape: bf16[32,32], index: 6, kind: input, shape index: {}]   ;;  %s1631_s7 = inlined_call_operand.vmem [shape: f32[1,32], index: 7, kind: input, shape index: {}]   ;;  %s1632_s8 = inlined_call_operand.<no memory space> [shape: f32[1,1], index: 8, kind: input, shape index: {}]   ;;  %s1633_s9 = inlined_call_operand.vmem [shape: bf16[64,16], index: 9, kind: input, shape index: {}]   ;;  %s1634_s10 = inlined_call_operand.vmem [shape: f32[1,16], index: 10, kind: input, shape index: {}]   ;;  %s1635_s11 = inlined_call_operand.vmem [shape: f32[2,16,32], index: 11, kind: input, shape index: {}]   ;;  %s1636_s12 = inlined_call_operand.vmem [shape: f32[2,16,32], index: 12, kind: input, shape index: {}]   ;;  %s1637_s13 = inlined_call_operand.hbm [shape: f32[8,2,16], index: 13, kind: output, shape index: {}]  }
   0x1   :  { %v18_v0 = vstv %s1632_s8 }
   0x2   :  { %19 = vst [vmem:[#allocation2] sm:$0x1] %v18_v0 }
   0x3   :  { %20 = vsyncpa [#allocation4], 0  ;;  %v48_v1 = vlaneseq  ;;  %v1253_v3 = vmov 0.0   ;;  %v1343_v5 = vmov 0.0   ;;  %v1345_v6 = vmov 0.0   ;;  %s1357_s8 = smov 0  }
   0x4   :  { %v1347_v7 = vmov 0.0   ;;  %v1349_v8 = vmov 0.0   ;;  %v1351_v9 = vmov 0.0   ;;  %v1353_v10 = vmov 0.0  }
   0x5   :  { %v1338_v2 = vand.u32 127, %v48_v1  ;;  %v1355_v11 = vmov 0.0  }
   0x7   :  { %vm50_vm0 = vcmp.eq.s32.totalorder %v1338_v2, 1 }
   0x8   :  { %v938_v4 = vsel %vm50_vm0, 1.0, %v1253_v3  }
   0x9 LB: > { %v1114_v12 = vld [vmem:[%s1624_s0] sm:$0xff]   ;;  %v1254_v13 = vmov 0.0   ;;  %vm76_vm1 = vcmask 130048   ;;  %vm1255_vm2 = vmmov 0   ;;  %v67_v14 = vpack.c.bf16 %v1219_v4, %v1219_v4  ;;  %s1256_s16 = smov 96   ;;  %v1118_v19 = vld [vmem:[%s1625_s1 + $0x8] sm:$0xff]   ;;  %s1251_s8 = sphi %s1357_s8, %s58_s8   ;;  %v1247_v11 = vphi %v1355_v11, %v1445_v11   ;;  %v1243_v10 = vphi %v1353_v10, %v751_v10   ;;  %v1239_v9 = vphi %v1351_v9, %v760_v9   ;;  %v1235_v8 = vphi %v1349_v8, %v1528_v8   ;;  %v1231_v7 = vphi %v1347_v7, %v1531_v7   ;;  %v1227_v6 = vphi %v1345_v6, %v1534_v6   ;;  %v1223_v5 = vphi %v1343_v5, %v1537_v5   ;;  %v1219_v4 = vphi %v938_v4, %v964_v4  }
   0xa   : > { %983 = vmatprep.subr.bf16.mxu0 %v1254_v13  ;;  %989 = vmatprep.subr.bf16.mxu1 %v1254_v13  ;;  %v213_v15 = vpack.c.bf16 %v1247_v11, %v1247_v11  ;;  %v1115_v16 = vld [vmem:[%s1626_s2] sm:$0xff]   ;;  %vm122_vm3 = vcmask 1041409   ;;  %v1116_v20 = vld [vmem:[%s1626_s2 + $0x8] sm:$0xff]   ;;  %v1119_v21 = vld [vmem:[%s1625_s1 + $0x10] sm:$0xff]   ;;  %s1257_s23 = smov 32   ;;  %vm127_vm4 = vcmask 261120  }
   0xb   : > { %984 = vmatpush3.bf16.msra.mxu0 %v1114_v12  ;;  %985 = vmatprep.mubr.msk.bf16.mxu0 %vm1255_vm2, %v1254_v13  ;;  %v1117_v17 = vld [vmem:[%s1625_s1] sm:$0xff]   ;;  %v123_v18 = vsel %vm122_vm3, %v1239_v9, %v1243_v10  ;;  %v1120_v22 = vld [vmem:[%s1625_s1 + $0x18] sm:$0xff]   ;;  %vm169_vm5 = vcmask 523264   ;;  %s1258_s28 = smov 64   ;;  %v1259_v52 = vmov 0   ;;  %v1122_v55 = vld [vmem:[%s1630_s6 + $0x8] sm:$0xff]  }
   0xc   : > { %1001 = vmatprep.subr.bf16.mxu0 %v1254_v13  ;;  %997 = vmatprep.mubr.msk.bf16.mxu1 %vm1255_vm2, %v1254_v13  ;;  %v947_v31 = vld [vmem:[%s1628_s4] ss:$0 sm:$0xff]  ;;  %v1454_v62 = vshrl.u32 %v48_v1, 7  ;;  %v330_v63 = vadd.s32 4294967287, %v1338_v2  ;;  %v325_v0 = vadd.s32 4294967295, %v1338_v2  ;;  %v355_v4 = vadd.s32 4294967289, %v1338_v2 }
   0xd   : > { %226 = vrot.lane.b32.xlu0 %v213_v15, %s1256_s16  ;;  %990 = vmatpush3.bf16.msra.mxu1 %v1117_v17  ;;  %v941_v37 = vld [vmem:[%s1627_s3] ss:$0 sm:$0xff]  ;;  %vm335_vm6 = vcmask 138312   ;;  %vm360_vm7 = vcmask 121912   ;;  %vm348_vm8 = vcmask 7168   ;;  %vm371_vm9 = vcmask 1042434  }
   0xe   : > { %986 = vmatmul.mubr.msk.bf16.vlgmr.msra.gmra.mrb[0].mxu0 %vm76_vm1, %v67_v14  ;;  %991 = vmatprep.subr.bf16.mxu1 %v1254_v13  ;;  %v1121_v54 = vld [vmem:[%s1630_s6] sm:$0xff]   ;;  %vm374_vm10 = vcmask 121856   ;;  %vm619_vm11 = vcmask 130112   ;;  %vm632_vm12 = vcmask 123904  }
   0xf   : > { %1002 = vmatpush3.bf16.msra.mxu0 %v1115_v16  ;;  %1005 = vmatprep.mubr.msk.bf16.mxu0 %vm1255_vm2, %v1254_v13 }
  0x10   : > { %1003 = vmatprep.subr.bf16.mxu0 %v1254_v13  ;;  %1113 = vset.pattern.permute.xlu1 %v1259_v52 }
  0x11   : > { %124 = vrot.lane.b32.xlu0 %v123_v18, %s1257_s23  ;;  %992 = vmatpush3.bf16.msra.mxu1 %v1118_v19 }
  0x12   : > { %993 = vmatprep.subr.bf16.mxu1 %v1254_v13  ;;  %1112 = vset.pattern.permute.xlu0 %v1259_v52 }
  0x13   : > { %1004 = vmatpush3.bf16.msra.mxu0 %v1116_v20 }
  0x14   : > { %1009 = vmatprep.subr.bf16.mxu0 %v1254_v13 }
  0x15   : > { %994 = vmatpush3.bf16.msra.mxu1 %v1119_v21 }
  0x16   : > { %995 = vmatprep.subr.bf16.mxu1 %v1254_v13 }
  0x19   : > { %996 = vmatpush3.bf16.msra.mxu1 %v1120_v22 }
  0x1a   : > { %1017 = vmatprep.subr.bf16.mxu1 %v1254_v13 }
  0x7f   : > { %v227_v23 = vpop.permute.xlu0 %226 }
  0x80   : > { %1006 = vmatmul.mubr.msk.bf16.vlgmr.msra.gmra.mrb[4].mxu0 %vm127_vm4, %v227_v23 }
  0x81   : > { %1013 = vmatprep.mubr.msk.bf16.mxu0 %vm1255_vm2, %v1254_v13  ;;  %1010 = vmatpush3.bf16.msra.mxu0 %v1121_v54 }
  0x82   : > { %1011 = vmatprep.subr.bf16.mxu0 %v1254_v13 }
  0x83   : > { %v125_v24 = vpop.permute.xlu0 %124 }
  0x85   : > { %1012 = vmatpush3.bf16.msra.mxu0 %v1122_v55 }
  0xe1   : > { %v114_v25 = vpop.f32.mrb[0].mxu0 }
  0xe2   : > { %v128_v26 = vsel %vm127_vm4, %v114_v25, %v125_v24  ;;  %v987_v27 = vpop.f32.mrb[1].mxu0  ;;  %v1473_v24 = vsub.s32 0, %v1454_v62 }
  0xe3   : > { %v129_v28 = vpack.c.bf16 %v128_v26, %v128_v26  ;;  %v117_v29 = vpop.f32.mrb[2].mxu0 }
  0xe4   : > { %v988_v30 = vpop.f32.mrb[3].mxu0 }
  0xe5   : > { %998 = vmatmul.mubr.msk.bf16.vlgmr.msra.gmra.mrb[0].mxu1 %vm169_vm5, %v129_v28  ;;  %v1476_v28 = vsub.s32 1, %v1454_v62 }
  0xe6   : > { %1025 = vmatprep.mubr.msk.bf16.mxu1 %vm1255_vm2, %v1254_v13 }
 0x153   : > { %v277_v32 = vpop.f32.mrb[4].mxu0 }
 0x154   : > { %v278_v33 = vadd.f32 %v947_v31, %v277_v32  ;;  %v1007_v34 = vpop.f32.mrb[5].mxu0 }
 0x155   : > { %v280_v35 = vpop.f32.mrb[6].mxu0 }
 0x156   : > { %v1008_v36 = vpop.f32.mrb[7].mxu0  ;;  %291 = vrot.lane.b32.xlu1 %v278_v33, %s1258_s28 }
 0x157   : > { %v436_v36 = vsub.s32 2, %v1454_v62 }
 0x1b8   : > { %v207_v38 = vpop.f32.mrb[0].mxu1 }
 0x1b9   : > { %v208_v39 = vadd.f32 %v941_v37, %v207_v38  ;;  %v999_v40 = vpop.f32.mrb[1].mxu1 }
 0x1ba   : > { %v210_v41 = vpop.f32.mrb[2].mxu1 }
 0x1bb   : > { %v283_v42 = vadd.f32 %v278_v33, %v208_v39  ;;  %v1000_v43 = vpop.f32.mrb[3].mxu1 }
 0x1bd   : > { %v951_v44 = vmul.f32 -1.442695, %v283_v42  ;;  %v1260_v42 = vmov 1966171168  }
 0x1be   : > { %v522_v43 = vunpack.c.l.s4 %v1260_v42 }
 0x1bf   : > { %1127 = vpow2.f32 %v951_v44 }
 0x1c0   : > { %v523_v44 = vunpack.c.0.s8 %v522_v43 }
 0x1c8   : > { %v292_v47 = vpop.permute.xlu1 %291 }
 0x1c9   : > { %v1128_v45 = vpop.eup %1127 }
 0x1ca   : > { %v287_v46 = vadd.f32 1.0, %v1128_v45  ;;  %v376_v45 = vld [vmem:[%s1629_s5] sm:$0x7] }
 0x1cc   : > { %1129 = vrcp.f32 %v287_v46 }
 0x1d6   : > { %v1130_v48 = vpop.eup %1129 }
 0x1d7   : > { %v294_v49 = vmul.f32 %v1130_v48, %v292_v47  ;;  %v301_v56 = vsub.f32 1.0, %v1130_v48  ;;  %v307_v58 = vmul.f32 %v1247_v11, %v1130_v48  ;;  %v402_v48 = vrot.slane %v376_v45, %v1473_v24 }
 0x1d9   : > { %296 = vrot.lane.b32.xlu1 %v294_v49, %s1258_s28  ;;  %v414_v49 = vrot.slane %v376_v45, %v1476_v28 }
 0x24b   : > { %v297_v50 = vpop.permute.xlu1 %296 }
 0x24c   : > { %v299_v51 = vadd.f32 %v297_v50, %v208_v39  ;;  %v526_v50 = vsub.s32 %v523_v44, %v1454_v62 }
 0x24e   : > { %1131 = vtanh.f32 %v299_v51  ;;  %v448_v51 = vrot.slane %v376_v45, %v436_v36 }
 0x258   : > { %v1132_v53 = vpop.eup %1131 }
 0x259   : > { %303 = vrot.lane.b32.xlu0 %v1132_v53, %s1256_s16 }
 0x25d   : > { %314 = vperm.xlu0 %1112, %v1235_v8   ;;  %v358_v8 = vsub.s32 %v355_v4, %v1454_v62 }
 0x261   : > { %323 = vperm.xlu0 %1112, %v1223_v5   ;;  %v350_v5 = vadd.s32 1, %v1338_v2 }
 0x263   : > { %v353_v9 = vsub.s32 %v350_v5, %v1454_v62 }
 0x2cb   : > { %v304_v57 = vpop.permute.xlu0 %303 }
 0x2cc   : > { %v306_v59 = vmul.f32 %v304_v57, %v301_v56 }
 0x2ce   : > { %v1445_v11 = vadd.f32 %v307_v58, %v306_v59  }
 0x2d0   : > { %v457_v60 = vpack.c.bf16 %v1445_v11, %v1445_v11 }
 0x2d2   : > { %463 = vrot.lane.b32.xlu1 %v457_v60, %s1256_s16 }
 0x2d6   : > { %317 = vperm.xlu1 %1113, %v1231_v7   ;;  %v333_v7 = vsub.s32 %v330_v63, %v1454_v62 }
 0x2da   : > { %320 = vperm.xlu1 %1113, %v1227_v6   ;;  %v328_v6 = vsub.s32 %v325_v0, %v1454_v62 }
 0x2dc   : > { %v1458_v3 = vpop.permute.xlu0 %314 }
 0x2dd   : > { %v329_v15 = vrot.slane %v1458_v3, %v328_v6  ;;  %v354_v17 = vrot.slane %v1458_v3, %v353_v9  ;;  %v415_v55 = vmul.f32 %v414_v49, %v1458_v3  ;;  %v543_v3 = vld [vmem:[%s1635_s11] sm:$0xff] }
 0x2e0   : > { %v1466_v12 = vpop.permute.xlu0 %323 }
 0x2e1   : > { %v344_v18 = vrot.slane %v1466_v12, %v333_v7  ;;  %v369_v19 = vrot.slane %v1466_v12, %v358_v8  ;;  %v418_v5 = vmul.f32 %v414_v49, %v1466_v12 }
 0x344   : > { %v464_v61 = vpop.permute.xlu1 %463 }
 0x345   : > { %1014 = vmatmul.mubr.msk.bf16.vlgmr.msra.gmra.mrb[8].mxu0 %vm127_vm4, %v464_v61 }
 0x355   : > { %v318_v10 = vpop.permute.xlu1 %317 }
 0x356   : > { %v334_v14 = vrot.slane %v318_v10, %v333_v7  ;;  %v359_v16 = vrot.slane %v318_v10, %v358_v8  ;;  %v416_v60 = vmul.f32 %v414_v49, %v318_v10  ;;  %v544_v10 = vld [vmem:[%s1635_s11 + $0x8] sm:$0xff] }
 0x358   : > { %v336_v23 = vsel %vm335_vm6, %v334_v14, %v329_v15  ;;  %v361_v26 = vsel %vm360_vm7, %v359_v16, %v354_v17 }
 0x359   : > { %v321_v20 = vpop.permute.xlu1 %320 }
 0x35a   : > { %v340_v21 = vrot.slane %v321_v20, %v328_v6  ;;  %v365_v22 = vrot.slane %v321_v20, %v353_v9  ;;  %v417_v14 = vmul.f32 %v414_v49, %v321_v20  ;;  %v545_v20 = vld [vmem:[%s1635_s11 + $0x10] sm:$0xff] }
 0x35c   : > { %v345_v25 = vsel %vm335_vm6, %v344_v18, %v340_v21  ;;  %v370_v27 = vsel %vm360_vm7, %v369_v19, %v365_v22 }
 0x35d   : > { %v346_v29 = vsel %vm122_vm3, %v345_v25, %v336_v23  ;;  %v372_v32 = vsel %vm371_vm9, %v370_v27, %v361_v26  ;;  %v546_v25 = vld [vmem:[%s1635_s11 + $0x18] sm:$0xff] }
 0x35e   : > { %v349_v30 = vsel %vm348_vm8, 0.0, %v346_v29  ;;  %v375_v34 = vsel %vm374_vm10, %v372_v32, 0.0 }
 0x35f   : > { %v380_v31 = vrot.slane %v349_v30, %v1473_v24  ;;  %v391_v33 = vrot.slane %v349_v30, %v1476_v28  ;;  %v426_v35 = vrot.slane %v375_v34, %v1476_v28  ;;  %v437_v37 = vrot.slane %v375_v34, %v436_v36 }
 0x361   : > { %386 = vbcast.lane.b32.xlu0 %v380_v31, 264  ;;  %382 = vbcast.lane.b32.xlu1 %v380_v31, 256 }
 0x365   : > { %397 = vbcast.lane.b32.xlu0 %v391_v33, 264  ;;  %393 = vbcast.lane.b32.xlu1 %v391_v33, 256 }
 0x369   : > { %432 = vbcast.lane.b32.xlu0 %v426_v35, 264  ;;  %428 = vbcast.lane.b32.xlu1 %v426_v35, 256 }
 0x36d   : > { %443 = vbcast.lane.b32.xlu0 %v437_v37, 264  ;;  %439 = vbcast.lane.b32.xlu1 %v437_v37, 256 }
 0x3d3   : > { %v387_v38 = vpop.permute.xlu0 %386  ;;  %v383_v39 = vpop.permute.xlu1 %382 }
 0x3d4   : > { %v404_v52 = vmul.f32 %v402_v48, %v387_v38  ;;  %v403_v56 = vmul.f32 %v402_v48, %v383_v39  ;;  %v955_v39 = vld [vmem:[%s1631_s7] ss:$0 sm:$0xff] }
 0x3d6   : > { %v420_v15 = vadd.f32 %v416_v60, %v404_v52  ;;  %v419_v18 = vadd.f32 %v415_v55, %v403_v56  ;;  %v956_v52 = vld [vmem:[#allocation2] ss:$0 sm:$0xff]  ;;  %v614_v55 = vadd.s32 4294967288, %v1338_v2 }
 0x3d7   : > { %v398_v40 = vpop.permute.xlu0 %397  ;;  %v394_v41 = vpop.permute.xlu1 %393 }
 0x3d8   : > { %v406_v61 = vmul.f32 %v402_v48, %v398_v40  ;;  %v405_v63 = vmul.f32 %v402_v48, %v394_v41 }
 0x3da   : > { %v422_v21 = vadd.f32 %v418_v5, %v406_v61  ;;  %v421_v22 = vadd.f32 %v417_v14, %v405_v63 }
 0x3db   : > { %v433_v46 = vpop.permute.xlu0 %432  ;;  %v429_v47 = vpop.permute.xlu1 %428 }
 0x3dc   : > { %v450_v0 = vmul.f32 %v448_v51, %v433_v46  ;;  %v449_v7 = vmul.f32 %v448_v51, %v429_v47 }
 0x3de   : > { %v454_v23 = vadd.f32 %v450_v0, %v420_v15  ;;  %v453_v26 = vadd.f32 %v449_v7, %v419_v18 }
 0x3df   : > { %v444_v53 = vpop.permute.xlu0 %443  ;;  %v440_v57 = vpop.permute.xlu1 %439 }
 0x3e0   : > { %v452_v16 = vmul.f32 %v448_v51, %v444_v53  ;;  %v451_v17 = vmul.f32 %v448_v51, %v440_v57  ;;  %v612_v57 = vsub.s32 %v1338_v2, %v1454_v62 }
 0x3e2   : > { %v456_v31 = vadd.f32 %v452_v16, %v422_v21  ;;  %v455_v32 = vadd.f32 %v451_v17, %v421_v22 }
 0x418   : > { %v514_v54 = vpop.f32.mrb[8].mxu0 }
 0x419   : > { %v527_v58 = vrot.slane %v514_v54, %v526_v50  ;;  %v1015_v59 = vpop.f32.mrb[9].mxu0 }
 0x41a   : > { %v517_v4 = vpop.f32.mrb[10].mxu0 }
 0x41b   : > { %v528_v6 = vcombine.high %v527_v58, %v527_v58  ;;  %v535_v8 = vrot.slane %v527_v58, %v526_v50  ;;  %v1016_v9 = vpop.f32.mrb[11].mxu0  ;;  %v617_v58 = vsub.s32 %v614_v55, %v1454_v62 }
 0x41d   : > { %v542_v19 = vrot.slane %v528_v6, %v526_v50  ;;  %v550_v12 = vrot.slane %v535_v8, %v1473_v24 }
 0x41f   : > { %v554_v27 = vrot.slane %v542_v19, %v1473_v24  ;;  %v557_v29 = vadd.f32 %v550_v12, %v543_v3  ;;  %v558_v30 = vadd.f32 %v550_v12, %v544_v10 }
 0x421   : > { %v559_v33 = vadd.f32 %v554_v27, %v545_v20  ;;  %v560_v34 = vadd.f32 %v554_v27, %v546_v25  ;;  %v561_v35 = vadd.f32 %v557_v29, %v453_v26  ;;  %v562_v36 = vadd.f32 %v558_v30, %v454_v23 }
 0x423   : > { %v563_v37 = vadd.f32 %v559_v33, %v455_v32  ;;  %v564_v38 = vadd.f32 %v560_v34, %v456_v31  ;;  %1133 = vtanh.f32 %v561_v35 }
 0x424   : > { %1135 = vtanh.f32 %v562_v36 }
 0x425   : > { %1137 = vtanh.f32 %v563_v37 }
 0x426   : > { %1139 = vtanh.f32 %v564_v38 }
 0x42d   : > { %v1134_v40 = vpop.eup %1133 }
 0x42e   : > { %v1136_v41 = vpop.eup %1135  ;;  %v576_v42 = vmul.f32 %v1134_v40, %v955_v39 }
 0x42f   : > { %v1138_v43 = vpop.eup %1137  ;;  %v577_v44 = vmul.f32 %v1136_v41, %v955_v39 }
 0x430   : > { %v1140_v45 = vpop.eup %1139  ;;  %v580_v46 = vsel %vm127_vm4, %v576_v42, 0.0  ;;  %v578_v49 = vmul.f32 %v1138_v43, %v955_v39 }
 0x431   : > { %v583_v47 = vsel %vm127_vm4, %v577_v44, 0.0  ;;  %581 = vadd.xlane.f32.xlu1 %v580_v46  ;;  %v579_v48 = vmul.f32 %v1140_v45, %v955_v39 }
 0x432   : > { %584 = vadd.xlane.f32.xlu0 %v583_v47  ;;  %v586_v51 = vsel %vm127_vm4, %v578_v49, 0.0  ;;  %v1125_v47 = vld [vmem:[%s1633_s9 + $0x10] sm:$0xff]  }
 0x433   : > { %v589_v50 = vsel %vm127_vm4, %v579_v48, 0.0  ;;  %v715_v48 = vld [vmem:[%s1636_s12] sm:$0xff] }
 0x435   : > { %590 = vadd.xlane.f32.xlu1 %v589_v50  ;;  %v716_v50 = vld [vmem:[%s1636_s12 + $0x8] sm:$0xff] }
 0x436   : > { %587 = vadd.xlane.f32.xlu0 %v586_v51 }
 0x44c   : > { %599 = vperm.xlu0 %1112, %v956_v52  }
 0x4be   : > { %v582_v54 = vpop.xlane.xlu1 %581 }
 0x4bf   : > { %v585_v53 = vpop.xlane.xlu0 %584 }
 0x4c2   : > { %v591_v59 = vpop.xlane.xlu1 %590 }
 0x4c3   : > { %v588_v56 = vpop.xlane.xlu0 %587 }
 0x4cb   : > { %v600_v60 = vpop.permute.xlu0 %599 }
 0x4cc   : > { %v602_v61 = vadd.f32 %v600_v60, %v582_v54  ;;  %v603_v63 = vadd.f32 %v600_v60, %v585_v53  ;;  %v604_v0 = vadd.f32 %v600_v60, %v588_v56  ;;  %v605_v4 = vadd.f32 %v600_v60, %v591_v59  ;;  %v718_v60 = vld [vmem:[%s1636_s12 + $0x18] sm:$0xff] }
 0x4ce   : > { %v613_v5 = vrot.slane %v602_v61, %v612_v57  ;;  %v618_v7 = vrot.slane %v603_v63, %v617_v58  ;;  %v624_v6 = vrot.slane %v604_v0, %v612_v57  ;;  %v628_v8 = vrot.slane %v605_v4, %v617_v58 }
 0x4d0   : > { %v620_v9 = vsel %vm619_vm11, %v618_v7, %v613_v5  ;;  %v629_v14 = vsel %vm619_vm11, %v628_v8, %v624_v6 }
 0x4d1   : > { %v630_v15 = vsel %vm122_vm3, %v629_v14, %v620_v9 }
 0x4d2   : > { %v633_v62 = vsel %vm632_vm12, %v630_v15, -inf }
 0x4d3   : > { %634 = vmax.xlane.f32.xlu1 %v633_v62 }
 0x560   : > { %v635_v16 = vpop.xlane.xlu1 %634 }
 0x561   : > { %v640_v17 = vrot.slane %v635_v16, %v1473_v24  ;;  %v644_v3 = vrot.slane %v635_v16, %v1476_v28 }
 0x563   : > { %v647_v10 = vsub.f32 %v602_v61, %v640_v17  ;;  %v648_v18 = vsub.f32 %v603_v63, %v640_v17  ;;  %v649_v19 = vsub.f32 %v604_v0, %v644_v3  ;;  %v650_v12 = vsub.f32 %v605_v4, %v644_v3  ;;  %v1126_v17 = vld [vmem:[%s1633_s9 + $0x18] sm:$0xff]  }
 0x565   : > { %v651_v21 = vmul.f32 1.442695, %v647_v10  ;;  %v653_v22 = vmul.f32 1.442695, %v648_v18  ;;  %v655_v23 = vmul.f32 1.442695, %v649_v19 }
 0x566   : > { %v657_v20 = vmul.f32 1.442695, %v650_v12 }
 0x567   : > { %1141 = vpow2.f32 %v651_v21 }
 0x568   : > { %1143 = vpow2.f32 %v653_v22 }
 0x569   : > { %1145 = vpow2.f32 %v655_v23 }
 0x56a   : > { %1147 = vpow2.f32 %v657_v20 }
 0x571   : > { %v1142_v25 = vpop.eup %1141 }
 0x572   : > { %v1144_v26 = vpop.eup %1143  ;;  %664 = vperm.xlu1 %1113, %v1142_v25  }
 0x573   : > { %667 = vperm.xlu0 %1112, %v1144_v26   ;;  %v1146_v27 = vpop.eup %1145 }
 0x574   : > { %v1148_v29 = vpop.eup %1147 }
 0x576   : > { %670 = vperm.xlu1 %1113, %v1146_v27  }
 0x577   : > { %673 = vperm.xlu0 %1112, %v1148_v29  }
 0x5f1   : > { %v665_v30 = vpop.permute.xlu1 %664 }
 0x5f2   : > { %v668_v31 = vpop.permute.xlu0 %667  ;;  %v678_v33 = vrot.slane %v665_v30, %v612_v57 }
 0x5f3   : > { %v682_v32 = vrot.slane %v668_v31, %v617_v58 }
 0x5f5   : > { %v671_v34 = vpop.permute.xlu1 %670  ;;  %v683_v38 = vsel %vm619_vm11, %v682_v32, %v678_v33 }
 0x5f6   : > { %v674_v35 = vpop.permute.xlu0 %673  ;;  %v687_v36 = vrot.slane %v671_v34, %v612_v57  ;;  %v717_v57 = vld [vmem:[%s1636_s12 + $0x10] sm:$0xff] }
 0x5f7   : > { %v691_v37 = vrot.slane %v674_v35, %v617_v58 }
 0x5f9   : > { %v692_v39 = vsel %vm619_vm11, %v691_v37, %v687_v36 }
 0x5fa   : > { %v693_v40 = vsel %vm122_vm3, %v692_v39, %v683_v38 }
 0x5fb   : > { %v695_v41 = vsel %vm632_vm12, %v693_v40, 0.0 }
 0x5fc   : > { %696 = vadd.xlane.f32.xlu1 %v695_v41 }
 0x689   : > { %v697_v42 = vpop.xlane.xlu1 %696 }
 0x68a   : > { %v702_v43 = vrot.slane %v697_v42, %v1473_v24  ;;  %v706_v44 = vrot.slane %v697_v42, %v1476_v28  ;;  %v1123_v24 = vld [vmem:[%s1633_s9] sm:$0xff]   ;;  %v1124_v28 = vld [vmem:[%s1633_s9 + $0x8] sm:$0xff]  }
 0x68b   : > { %1018 = vmatpush3.bf16.msra.mxu1 %v1123_v24 }
 0x68c   : > { %1149 = vrcp.f32 %v702_v43  ;;  %1019 = vmatprep.subr.bf16.mxu1 %v1254_v13 }
 0x68d   : > { %1151 = vrcp.f32 %v706_v44 }
 0x68f   : > { %1020 = vmatpush3.bf16.msra.mxu1 %v1124_v28 }
 0x690   : > { %1021 = vmatprep.subr.bf16.mxu1 %v1254_v13 }
 0x693   : > { %1022 = vmatpush3.bf16.msra.mxu1 %v1125_v47 }
 0x694   : > { %1023 = vmatprep.subr.bf16.mxu1 %v1254_v13 }
 0x696   : > { %v1150_v45 = vpop.eup %1149 }
 0x697   : > { %v1528_v8 = vmul.f32 %v1150_v45, %v1142_v25   ;;  %v1531_v7 = vmul.f32 %v1150_v45, %v1144_v26   ;;  %v1152_v46 = vpop.eup %1151  ;;  %1024 = vmatpush3.bf16.msra.mxu1 %v1126_v17 }
 0x698   : > { %v1534_v6 = vmul.f32 %v1152_v46, %v1146_v27   ;;  %v1537_v5 = vmul.f32 %v1152_v46, %v1148_v29   ;;  %v957_v27 = vld [vmem:[%s1634_s10] ss:$0 sm:$0xff] }
 0x699   : > { %721 = vperm.xlu0 %1112, %v1528_v8  }
 0x69d   : > { %726 = vperm.xlu0 %1112, %v1531_v7  }
 0x6a1   : > { %731 = vperm.xlu0 %1112, %v1534_v6  }
 0x6a5   : > { %736 = vperm.xlu0 %1112, %v1537_v5  }
 0x6a9   : > { %762 = vrot.lane.b32.xlu0 %v1445_v11, %s1256_s16 }
 0x718   : > { %v722_v49 = vpop.permute.xlu0 %721 }
 0x719   : > { %v739_v51 = vmul.f32 %v722_v49, %v715_v48 }
 0x71b   : > { %v743_v54 = vsel %vm127_vm4, %v739_v51, 0.0 }
 0x71c   : > { %v727_v52 = vpop.permute.xlu0 %726 }
 0x71d   : > { %v740_v53 = vmul.f32 %v727_v52, %v716_v50 }
 0x71f   : > { %v744_v55 = vsel %vm127_vm4, %v740_v53, 0.0 }
 0x720   : > { %v745_v56 = vadd.f32 %v744_v55, %v743_v54  ;;  %v732_v58 = vpop.permute.xlu0 %731 }
 0x721   : > { %v741_v61 = vmul.f32 %v732_v58, %v717_v57 }
 0x722   : > { %v746_v59 = vrot.slane %v745_v56, 4 }
 0x723   : > { %v752_v9 = vsel %vm127_vm4, %v741_v61, 0.0 }
 0x724   : > { %v747_v63 = vadd.f32 %v746_v59, %v745_v56  ;;  %v737_v0 = vpop.permute.xlu0 %736 }
 0x725   : > { %v742_v4 = vmul.f32 %v737_v0, %v718_v60 }
 0x726   : > { %v748_v15 = vrot.slane %v747_v63, 2 }
 0x727   : > { %v753_v14 = vsel %vm127_vm4, %v742_v4, 0.0 }
 0x728   : > { %v754_v62 = vadd.f32 %v753_v14, %v752_v9  ;;  %v749_v3 = vadd.f32 %v748_v15, %v747_v63  ;;  %v763_v23 = vpop.permute.xlu0 %762 }
 0x72a   : > { %v755_v16 = vrot.slane %v754_v62, 4  ;;  %v750_v12 = vrot.slane %v749_v3, 1 }
 0x72c   : > { %v756_v10 = vadd.f32 %v755_v16, %v754_v62 }
 0x72e   : > { %v757_v18 = vrot.slane %v756_v10, 2 }
 0x730   : > { %v758_v19 = vadd.f32 %v757_v18, %v756_v10  ;;  %v751_v10 = vadd.f32 %v750_v12, %v749_v3  }
 0x732   : > { %v759_v21 = vrot.slane %v758_v19, 1 }
 0x734   : > { %v760_v9 = vadd.f32 %v759_v21, %v758_v19  }
 0x736   : > { %v767_v22 = vsel %vm122_vm3, %v760_v9, %v751_v10 }
 0x737   : > { %768 = vrot.lane.b32.xlu0 %v767_v22, %s1257_s23  ;;  %s963_s23 = sshll.u32 %s1251_s8, 1  ;;  %s58_s8 = sadd.s32 1, %s1251_s8  }
 0x738   : > { %s869_s18 = scalar_lea.vmem [#allocation3], %s963_s23  ;;  %p55_p0 = scmp.ge.s32.totalorder %s58_s8, 8  }
 0x739   :  { %s1261_s19 = smov (%p55_p0), [#allocation3]  }
 0x73a   :  { %s896_s20 = sshll.u32 (%p55_p0), %s1261_s19, 4  ;;  %s897_s20 = int_to_ptr.vmem [resolvable:$true] %s896_s20 }
 0x73b   :  { %s1157_s21 = scalar_lea.vmem (%p55_p0), %s897_s20, 256  ;;  %p1162_p2 = scmp.lt.s32.totalorder (%p55_p0), %s897_s20, %s897_s20 }
 0x73c   :  { %p1158_p1 = scmp.ne.s32.totalorder (%p55_p0), %s897_s20, %s1157_s21  ;;  %p1163_p3 = scmp.lt.s32.totalorder (%p55_p0), %s1157_s21, %s1157_s21 }
 0x73e   :  { %p1164_p4 = por (%p55_p0), %p1163_p3, %p1162_p2 }
 0x740   :  { %p1165_p5 = pnand (%p55_p0), %p1164_p4, %p1158_p1 }
 0x7a9   : > { %v769_v20 = vpop.permute.xlu0 %768 }
 0x7aa   : > { %v771_v25 = vsel %vm127_vm4, %v763_v23, %v769_v20 }
 0x7ab   : > { %v772_v26 = vpack.c.bf16 %v771_v25, %v771_v25 }
 0x7ad   : > { %1026 = vmatmul.mubr.msk.bf16.vlgmr.msra.gmra.mrb[4].mxu1 %vm169_vm5, %v772_v26 }
 0x880   : > { %v849_v29 = vpop.f32.mrb[4].mxu1 }
 0x881   : > { %v850_v30 = vadd.f32 %v957_v27, %v849_v29  ;;  %v1027_v31 = vpop.f32.mrb[5].mxu1 }
 0x882   : > { %v852_v32 = vpop.f32.mrb[6].mxu1 }
 0x883   : > { %v1028_v33 = vpop.f32.mrb[7].mxu1  ;;  %v855_v34 = vsel %vm632_vm12, %v850_v30, -inf }
 0x884   : > { %856 = vmax.xlane.f32.xlu0 %v855_v34 }
 0x911   : > { %v857_v35 = vpop.xlane.xlu0 %856 }
 0x912   : > { %v858_v36 = vsub.f32 %v850_v30, %v857_v35  ;;  %vm871_vm13 = vcmp.eq.f32.partialorder %v850_v30, %v857_v35 }
 0x913   : > { %v872_v37 = vsel %vm871_vm13, %v1338_v2, 16 }
 0x914   : > { %v859_v38 = vmul.f32 1.442695, %v858_v36  ;;  %v873_v39 = vsel %vm632_vm12, %v872_v37, 2147483647 }
 0x915   : > { %v875_v40 = vshra.s32 %v873_v39, 16  ;;  %v874_v44 = vand.u32 65535, %v873_v39 }
 0x916   : > { %1153 = vpow2.f32 %v859_v38 }
 0x917   : > { %v877_v41 = vcvt.s32.f32 %v875_v40  ;;  %v876_v46 = vcvt.s32.f32 %v874_v44 }
 0x919   : > { %878 = vmin.xlane.f32.xlu1 %v877_v41 }
 0x920   : > { %v1154_v42 = vpop.eup %1153 }
 0x921   : > { %v861_v43 = vsel %vm632_vm12, %v1154_v42, 0.0 }
 0x922   : > { %862 = vadd.xlane.f32.xlu1 %v861_v43 }
 0x9a6   : > { %v879_v45 = vpop.xlane.xlu1 %878 }
 0x9a7   : > { %vm880_vm14 = vcmp.eq.f32.partialorder %v877_v41, %v879_v45  ;;  %v885_v51 = vcvt.f32.s32 %v879_v45 }
 0x9a8   : > { %v881_v24 = vsel %vm880_vm14, %v876_v46, inf }
 0x9a9   : > { %882 = vmin.xlane.f32.xlu1 %v881_v24  ;;  %v886_v53 = vshll.u32 %v885_v51, 16 }
 0x9af   : > { %v863_v28 = vpop.xlane.xlu1 %862 }
 0x9b0   : > { %1155 = vlog2.f32 %v863_v28 }
 0x9ba   : > { %v1156_v47 = vpop.eup %1155 }
 0x9bb   : > { %v865_v48 = vmul.f32 0.6931472, %v1156_v47 }
 0x9bd   : > { %v866_v49 = vadd.f32 %v865_v48, %v857_v35 }
 0x9bf   : > { %v867_v50 = vsub.f32 %v850_v30, %v866_v49 }
 0x9c1   : > { %870 = vst.msk [vmem:[%s869_s18] sm:$0x3] %vm632_vm12, %v867_v50 }
 0xa36   : > { %v883_v52 = vpop.xlane.xlu1 %882  ;;  %57 = sbr.rel (!%p55_p0) target bundleno = 9 (0x9), region = 80 }
 0xa37   : > { %v884_v54 = vcvt.f32.s32 %v883_v52 }
 0xa39   : > { %v887_v55 = vadd.s32 %v886_v53, %v884_v54 }
 0xa3b   : > { %vm888_vm15 = vcmp.eq.s32.totalorder %v1338_v2, %v887_v55 }
 0xa3c   : > { %v964_v4 = vsel %vm888_vm15, 1.0, %v1254_v13  }
 0xa3d   :  { %1168 = shalt.err (!%p1165_p5)
}
 0xa3e   :  { %s1169_s24 = scalar_lea.hbm %s1637_s13, 256 }
 0xa3f   :  { %p1170_p6 = scmp.ne.s32.totalorder %s1637_s13, %s1169_s24  ;;  %p1173_p7 = scmp.lt.u32.totalorder %s1169_s24, %s1637_s13 }
 0xa41   :  { %p1175_p8 = pnand %p1173_p7, %p1170_p6 }
 0xa43   :  { %1178 = shalt.err (!%p1175_p8)
}
 0xa44   :  { %s1262_s0 = smov 32   ;;  %s1263_s1 = smov 2  }
 0xa45   :  { %902 = dma.vmem_to_hbm [thread:$0]  %s897_s20, 256, %s1637_s13, [#allocation4], %s1262_s0, %s1262_s0, %s1263_s1  }
 0xa46   :  { %1215 = dma.done.wait [#allocation4], 256  }
 0xa47   :  { %1216 = vsyncadd [#allocation4], 4294967040 }
 0xa48   :  { %906 = vsyncpa [#allocation4], 1 }

</bundles_post_ra>
